<compile_context>
chip_gen: v7x
topology: tpu7x:2x2x1
jax: 0.10.0
libtpu: 0.0.40
codegen_flags: <defaults>
</compile_context>

<pallas_src>
import functools
import math

import jax
import jax.numpy as jnp
from jax import lax
from jax.experimental import pallas as pl
from jax.experimental.pallas import tpu as pltpu

LN_EPS = 1e-5  # nn.LayerNorm default


def _round_up(n: int, m: int) -> int:
    return ((n + m - 1) // m) * m


def _cdiv(a: int, b: int) -> int:
    return (a + b - 1) // b


def _vmem_budget_bytes() -> int:
    """Generation-aware VMEM budget with ~15% headroom for compiler scratch."""
    cap = 64 * 1024 * 1024  # conservative fallback = v7x physical per-TC VMEM
    try:
        cap = int(pltpu.get_tpu_info().vmem_capacity_bytes)
    except Exception:
        pass
    return max(32 * 1024 * 1024, int(cap * 0.85))


def _gelu_ff_kernel(x_ref, gamma_ref, beta_ref, w1_ref, b1_ref, w2_ref, b2_ref,
                    o_ref, xn_sc, *acc_scratch, acc_into_out: bool):
    # CORRECTNESS NOTE: writing o_ref only on the last kf step (and accumulating into
    # it when acc_into_out=True) is valid only because the output index_map ignores kf
    # (the output block stays resident across the reduction axis) and kf is the
    # innermost grid axis.  Do not reorder the grid or change out_specs without
    # revisiting this.
    acc = o_ref if acc_into_out else acc_scratch[0]
    kf = pl.program_id(1)

    # ---- once per token tile: LayerNorm (f32 stats, biased variance) + zero acc ----
    @pl.when(kf == 0)
    def _():
        x = x_ref[...].astype(jnp.float32)                      # (tm, D)
        mean = jnp.mean(x, axis=-1, keepdims=True)
        var = jnp.mean((x - mean) ** 2, axis=-1, keepdims=True)
        xn = (x - mean) * lax.rsqrt(var + LN_EPS)
        xn = xn * gamma_ref[...].astype(jnp.float32) + beta_ref[...].astype(jnp.float32)
        xn_sc[...] = xn.astype(xn_sc.dtype)                     # matmul dtype
        acc[...] = jnp.zeros_like(acc)

    # ---- Linear1 slab: (tm, D) @ (D, tff) + b1_k, f32 accumulation on the MXU ----
    h = jnp.dot(xn_sc[...], w1_ref[...], preferred_element_type=jnp.float32)
    h = h + b1_ref[...].astype(jnp.float32)

    # ---- exact GELU: x * 0.5 * (1 + erf(x / sqrt(2))), kept in f32 ----
    g = h * 0.5 * (1.0 + lax.erf(h * (1.0 / math.sqrt(2.0))))

    # ---- Linear2 slab: (tm, tff) @ (tff, D), f32 accumulation ----
    acc[...] += jnp.dot(g.astype(w2_ref.dtype), w2_ref[...],
                        preferred_element_type=jnp.float32).astype(acc.dtype)

    # ---- finalize on last FF slab ----
    @pl.when(kf == pl.num_programs(1) - 1)
    def _():
        o_ref[...] = (acc[...].astype(jnp.float32)
                      + b2_ref[...].astype(jnp.float32)).astype(o_ref.dtype)


def gelu_feed_forward(x, gamma, beta, w1, b1, w2, b2, *,
                      tm=512, tff=1024, matmul_dtype=jnp.bfloat16):
    """x: (..., input_dim). Weights stored as (in, out). Returns x.shape / x.dtype.

    NOTE: the default bf16 matmul path (and the wrapper-side bf16 cast of x) deviates
    from an all-f32 torch reference at ~bf16 precision by design.
    """
    orig_shape = x.shape
    D = orig_shape[-1]
    FF = w1.shape[1]
    out_dtype = x.dtype

    assert tm % 16 == 0, "token tile must be a multiple of 16 (bf16 sublane packing)"
    assert tff % 128 == 0, "FF tile must be a multiple of 128 (>=256 recommended on v6e/v7x)"

    x2 = x.reshape(-1, D)
    N = x2.shape[0]

    # Cast the streamed activations to the matmul dtype in the wrapper: halves the
    # input HBM traffic and the double-buffered input VMEM tile on the bf16 path.
    # LayerNorm statistics are still computed in f32 inside the kernel.
    if matmul_dtype == jnp.bfloat16 and x2.dtype != jnp.bfloat16:
        x2 = x2.astype(jnp.bfloat16)

    # --- token tiling: >=2 token tiles whenever there is enough work, so the
    #     "parallel" axis shards across both v7x TensorCores; multiples of 16. ---
    if N <= 16:
        tm_eff = _round_up(max(N, 1), 16)
    elif N <= tm:
        tm_eff = min(tm, _round_up(_cdiv(N, 2), 16))
    else:
        tm_eff = tm

    # --- FF slab width: full FF if it fits in one slab, else tff-wide slabs ---
    tff_eff = FF if FF <= tff else tff

    # --- generation-aware VMEM budget; shrink tiles until the footprint fits ---
    budget = _vmem_budget_bytes()
    x_item = jnp.dtype(x2.dtype).itemsize
    o_item = jnp.dtype(out_dtype).itemsize
    m_item = jnp.dtype(matmul_dtype).itemsize
    acc_into_out = jnp.dtype(out_dtype) == jnp.dtype(jnp.float32)

    def footprint(tm_, tff_):
        f = 2 * tm_ * D * x_item             # x tile (double-buffered)
        f += 2 * tm_ * D * o_item            # out tile (double-buffered)
        f += 2 * D * tff_ * m_item           # W1 slab (double-buffered)
        f += 2 * tff_ * D * m_item           # W2 slab (double-buffered)
        f += 2 * tff_ * 4 + 6 * D * 4        # b1 slab / gamma / beta / b2
        f += tm_ * D * m_item                # xn scratch
        if not acc_into_out:
            f += tm_ * D * 4                 # f32 accumulator scratch
        return f

    headroom = 4 * 1024 * 1024
    while footprint(tm_eff, tff_eff) > budget - headroom:
        if tff_eff >= 512:
            tff_eff //= 2                    # stays a multiple of 256
        elif tm_eff > 64:
            tm_eff = max(64, _round_up(tm_eff // 2, 16))
        else:
            break                            # tiny-D shapes never reach here

    Np = _round_up(N, tm_eff)
    FFp = _round_up(FF, tff_eff)
    n_slabs = FFp // tff_eff

    if Np != N:
        x2 = jnp.pad(x2, ((0, Np - N), (0, 0)))

    w1c = w1.astype(matmul_dtype)
    w2c = w2.astype(matmul_dtype)
    b1c = b1.reshape(1, FF).astype(jnp.float32)
    if FFp != FF:
        w1c = jnp.pad(w1c, ((0, 0), (0, FFp - FF)))
        b1c = jnp.pad(b1c, ((0, 0), (0, FFp - FF)))
        w2c = jnp.pad(w2c, ((0, FFp - FF), (0, 0)))

    # Pre-reshape W1 so each (D, tff) slab is a fully contiguous HBM chunk.
    w1c = w1c.reshape(D, n_slabs, tff_eff).transpose(1, 0, 2)   # (n_slabs, D, tff)

    gamma2 = gamma.reshape(1, D).astype(jnp.float32)
    beta2 = beta.reshape(1, D).astype(jnp.float32)
    b2_2 = b2.reshape(1, D).astype(jnp.float32)

    grid = (Np // tm_eff, n_slabs)

    scratch = [pltpu.VMEM((tm_eff, D), matmul_dtype)]          # post-LN activations
    if not acc_into_out:
        scratch.append(pltpu.VMEM((tm_eff, D), jnp.float32))   # f32 accumulator

    out = pl.pallas_call(
        functools.partial(_gelu_ff_kernel, acc_into_out=acc_into_out),
        out_shape=jax.ShapeDtypeStruct((Np, D), out_dtype),
        grid_spec=pltpu.PrefetchScalarGridSpec(
            num_scalar_prefetch=0,
            grid=grid,
            in_specs=[
                pl.BlockSpec((tm_eff, D), lambda i, kf: (i, 0)),           # x tile
                pl.BlockSpec((1, D), lambda i, kf: (0, 0)),                # gamma
                pl.BlockSpec((1, D), lambda i, kf: (0, 0)),                # beta
                pl.BlockSpec((None, D, tff_eff), lambda i, kf: (kf, 0, 0)),# W1 slab (contig)
                pl.BlockSpec((1, tff_eff), lambda i, kf: (0, kf)),         # b1 slab
                pl.BlockSpec((tff_eff, D), lambda i, kf: (kf, 0)),         # W2 slab
                pl.BlockSpec((1, D), lambda i, kf: (0, 0)),                # b2
            ],
            out_specs=pl.BlockSpec((tm_eff, D), lambda i, kf: (i, 0)),
            scratch_shapes=scratch,
        ),
        compiler_params=pltpu.CompilerParams(
            dimension_semantics=("parallel", "arbitrary"),
            vmem_limit_bytes=budget,
        ),
    )(x2, gamma2, beta2, w1c, b1c, w2c, b2_2)

    return out[:N].reshape(orig_shape)


if __name__ == "__main__":
    # Small shapes consistent with the module: (batch, seq, input_dim), ff_dim hidden.
    # seq=50 exercises ragged-token padding + the >=2 token-tile (megacore) split.
    batch, seq, input_dim, ff_dim = 2, 50, 128, 512

    key = jax.random.PRNGKey(0)
    kx, kg, kb, kw1, kb1, kw2, kb2 = jax.random.split(key, 7)

    x = jax.random.normal(kx, (batch, seq, input_dim), dtype=jnp.float32)

    gamma = jnp.ones((input_dim,), jnp.float32) + 0.1 * jax.random.normal(kg, (input_dim,))
    beta = 0.1 * jax.random.normal(kb, (input_dim,))

    w1 = jax.random.normal(kw1, (input_dim, ff_dim), dtype=jnp.float32) / math.sqrt(input_dim)
    b1 = 0.1 * jax.random.normal(kb1, (ff_dim,))

    # NOTE: the module zero-initializes linear2 (output would be trivially b2=0); random
    # weights here so the check exercises the second matmul — forward semantics are
    # identical for any weight values.
    w2 = jax.random.normal(kw2, (ff_dim, input_dim), dtype=jnp.float32) / math.sqrt(ff_dim)
    b2 = 0.1 * jax.random.normal(kb2, (input_dim,))

    # Pure-JAX f32 reference (LayerNorm -> Linear1 -> erf-GELU -> Linear2).
    xf = x.astype(jnp.float32)
    mu = xf.mean(-1, keepdims=True)
    var = ((xf - mu) ** 2).mean(-1, keepdims=True)
    xn = (xf - mu) / jnp.sqrt(var + LN_EPS) * gamma + beta
    h = xn @ w1 + b1
    g = h * 0.5 * (1.0 + lax.erf(h / math.sqrt(2.0)))
    ref = g @ w2 + b2

    # 1) f32 MXU operands, tff=256 -> 2 reduction steps, accumulate-into-output path.
    out_f32 = gelu_feed_forward(x, gamma, beta, w1, b1, w2, b2,
                                tm=512, tff=256, matmul_dtype=jnp.float32)
    out_f32 = jax.block_until_ready(out_f32)
    assert out_f32.shape == x.shape and out_f32.dtype == x.dtype
    assert jnp.allclose(out_f32, ref, atol=2e-2, rtol=2e-2)

    # 2) default fast path: bf16 streaming + bf16 MXU operands, f32 accumulation.
    out_bf16 = gelu_feed_forward(x, gamma, beta, w1, b1, w2, b2)
    out_bf16 = jax.block_until_ready(out_bf16)
    assert out_bf16.shape == x.shape and out_bf16.dtype == x.dtype
    assert jnp.allclose(out_bf16, ref, atol=6e-2, rtol=6e-2)

    # 3) bf16 input / bf16 output: exercises the separate f32 accumulator-scratch path.
    out_b = gelu_feed_forward(x.astype(jnp.bfloat16), gamma, beta, w1, b1, w2, b2,
                              tff=256)
    out_b = jax.block_until_ready(out_b)
    assert out_b.shape == x.shape and out_b.dtype == jnp.bfloat16
    assert jnp.allclose(out_b.astype(jnp.float32), ref, atol=1.5e-1, rtol=1e-1)

    print("KERNEL_OK")
</pallas_src>

<mosaic_0001>
module attributes {stable_mosaic.version = 11 : i64} {
  func.func @_gelu_ff_kernel(%arg0: i32, %arg1: i32, %arg2: memref<64x128xf32, #tpu.memory_space<vmem>>, %arg3: memref<1x128xf32, #tpu.memory_space<vmem>>, %arg4: memref<1x128xf32, #tpu.memory_space<vmem>>, %arg5: memref<1x128x256xf32, #tpu.memory_space<vmem>>, %arg6: memref<1x256xf32, #tpu.memory_space<vmem>>, %arg7: memref<256x128xf32, #tpu.memory_space<vmem>>, %arg8: memref<1x128xf32, #tpu.memory_space<vmem>>, %arg9: memref<64x128xf32, #tpu.memory_space<vmem>>, %arg10: memref<64x128xf32, #tpu.memory_space<vmem>>) attributes {dimension_semantics = [#tpu.dimension_semantics<parallel>, #tpu.dimension_semantics<arbitrary>], iteration_bounds = array<i64: 2, 2>, scalar_prefetch = 0 : i64, scratch_operands = 1 : i64, tpu.core_type = #tpu.core_type<tc>, window_params = [{transform_indices = @transform_0, window_bounds = array<i64: 64, 128>}, {pipeline_mode = #tpu.pipeline_mode<synchronous>, transform_indices = @transform_1, window_bounds = array<i64: 1, 128>}, {pipeline_mode = #tpu.pipeline_mode<synchronous>, transform_indices = @transform_2, window_bounds = array<i64: 1, 128>}, {transform_indices = @transform_3, window_bounds = array<i64: 1, 128, 256>}, {transform_indices = @transform_4, window_bounds = array<i64: 1, 256>}, {transform_indices = @transform_5, window_bounds = array<i64: 256, 128>}, {pipeline_mode = #tpu.pipeline_mode<synchronous>, transform_indices = @transform_6, window_bounds = array<i64: 1, 128>}, {transform_indices = @transform_7, window_bounds = array<i64: 64, 128>}]} {
    %c0_i32 = arith.constant 0 : i32
    %0 = arith.cmpi eq, %arg1, %c0_i32 : i32
    %1 = arith.extui %0 : i1 to i32
    %c0_i32_0 = arith.constant 0 : i32
    %2 = arith.cmpi ne, %1, %c0_i32_0 : i32
    scf.if %2 {
      %c0_18 = arith.constant 0 : index
      %c0_19 = arith.constant 0 : index
      %26 = vector.load %arg2[%c0_18, %c0_19] : memref<64x128xf32, #tpu.memory_space<vmem>>, vector<64x128xf32>
      %cst_20 = arith.constant dense<0.000000e+00> : vector<64xf32>
      %27 = vector.multi_reduction <add>, %26, %cst_20 [1] : vector<64x128xf32> to vector<64xf32>
      %28 = vector.shape_cast %27 : vector<64xf32> to vector<64x1xf32>
      %cst_21 = arith.constant 1.280000e+02 : f32
      %29 = vector.broadcast %cst_21 : f32 to vector<64x1xf32>
      %30 = arith.divf %28, %29 : vector<64x1xf32>
      %31 = vector.broadcast %30 : vector<64x1xf32> to vector<64x128xf32>
      %32 = arith.subf %26, %31 : vector<64x128xf32>
      %33 = arith.mulf %32, %32 : vector<64x128xf32>
      %cst_22 = arith.constant dense<0.000000e+00> : vector<64xf32>
      %34 = vector.multi_reduction <add>, %33, %cst_22 [1] : vector<64x128xf32> to vector<64xf32>
      %35 = vector.shape_cast %34 : vector<64xf32> to vector<64x1xf32>
      %cst_23 = arith.constant 1.280000e+02 : f32
      %36 = vector.broadcast %cst_23 : f32 to vector<64x1xf32>
      %37 = arith.divf %35, %36 : vector<64x1xf32>
      %38 = vector.broadcast %30 : vector<64x1xf32> to vector<64x128xf32>
      %39 = arith.subf %26, %38 : vector<64x128xf32>
      %cst_24 = arith.constant 9.99999974E-6 : f32
      %40 = vector.broadcast %cst_24 : f32 to vector<64x1xf32>
      %41 = arith.addf %37, %40 : vector<64x1xf32>
      %42 = math.rsqrt %41 : vector<64x1xf32>
      %43 = vector.broadcast %42 : vector<64x1xf32> to vector<64x128xf32>
      %44 = arith.mulf %39, %43 : vector<64x128xf32>
      %c0_25 = arith.constant 0 : index
      %c0_26 = arith.constant 0 : index
      %45 = vector.load %arg3[%c0_25, %c0_26] : memref<1x128xf32, #tpu.memory_space<vmem>>, vector<1x128xf32>
      %46 = vector.broadcast %45 : vector<1x128xf32> to vector<64x128xf32>
      %47 = arith.mulf %44, %46 : vector<64x128xf32>
      %c0_27 = arith.constant 0 : index
      %c0_28 = arith.constant 0 : index
      %48 = vector.load %arg4[%c0_27, %c0_28] : memref<1x128xf32, #tpu.memory_space<vmem>>, vector<1x128xf32>
      %49 = vector.broadcast %48 : vector<1x128xf32> to vector<64x128xf32>
      %50 = arith.addf %47, %49 : vector<64x128xf32>
      %c0_29 = arith.constant 0 : index
      %c0_30 = arith.constant 0 : index
      %51 = vector.load %arg10[%c0_29, %c0_30] : memref<64x128xf32, #tpu.memory_space<vmem>>, vector<64x128xf32>
      tpu.vector_store %arg10[%c0_29, %c0_30], %50 {strides = array<i32>} : memref<64x128xf32, #tpu.memory_space<vmem>>, vector<64x128xf32>,
      %cst_31 = arith.constant 0.000000e+00 : f32
      %52 = vector.broadcast %cst_31 : f32 to vector<64x128xf32>
      %c0_32 = arith.constant 0 : index
      %c0_33 = arith.constant 0 : index
      %53 = vector.load %arg9[%c0_32, %c0_33] : memref<64x128xf32, #tpu.memory_space<vmem>>, vector<64x128xf32>
      tpu.vector_store %arg9[%c0_32, %c0_33], %52 {strides = array<i32>} : memref<64x128xf32, #tpu.memory_space<vmem>>, vector<64x128xf32>,
    } else {
    }
    %c0 = arith.constant 0 : index
    %c0_1 = arith.constant 0 : index
    %3 = vector.load %arg10[%c0, %c0_1] : memref<64x128xf32, #tpu.memory_space<vmem>>, vector<64x128xf32>
    %c0_2 = arith.constant 0 : index
    %c0_3 = arith.constant 0 : index
    %c0_4 = arith.constant 0 : index
    %4 = vector.load %arg5[%c0_2, %c0_3, %c0_4] : memref<1x128x256xf32, #tpu.memory_space<vmem>>, vector<1x128x256xf32>
    %5 = vector.shape_cast %4 : vector<1x128x256xf32> to vector<128x256xf32>
    %cst = arith.constant dense<0.000000e+00> : vector<64x256xf32>
    %6 = tpu.matmul %3, %5, %cst {dimension_numbers = #tpu.dot_dimension_numbers<[1], [0], [0], [1], [0, 0, 1, 1], [], []>} : vector<64x128xf32>, vector<128x256xf32>, vector<64x256xf32> -> vector<64x256xf32>
    %c0_5 = arith.constant 0 : index
    %c0_6 = arith.constant 0 : index
    %7 = vector.load %arg6[%c0_5, %c0_6] : memref<1x256xf32, #tpu.memory_space<vmem>>, vector<1x256xf32>
    %8 = vector.broadcast %7 : vector<1x256xf32> to vector<64x256xf32>
    %9 = arith.addf %6, %8 : vector<64x256xf32>
    %cst_7 = arith.constant 5.000000e-01 : f32
    %10 = vector.broadcast %cst_7 : f32 to vector<64x256xf32>
    %11 = arith.mulf %9, %10 : vector<64x256xf32>
    %cst_8 = arith.constant 0.707106769 : f32
    %12 = vector.broadcast %cst_8 : f32 to vector<64x256xf32>
    %13 = arith.mulf %9, %12 : vector<64x256xf32>
    %14 = math.erf %13 : vector<64x256xf32>
    %cst_9 = arith.constant 1.000000e+00 : f32
    %15 = vector.broadcast %cst_9 : f32 to vector<64x256xf32>
    %16 = arith.addf %15, %14 : vector<64x256xf32>
    %17 = arith.mulf %11, %16 : vector<64x256xf32>
    %c0_10 = arith.constant 0 : index
    %c0_11 = arith.constant 0 : index
    %18 = vector.load %arg9[%c0_10, %c0_11] : memref<64x128xf32, #tpu.memory_space<vmem>>, vector<64x128xf32>
    %c0_12 = arith.constant 0 : index
    %c0_13 = arith.constant 0 : index
    %19 = vector.load %arg7[%c0_12, %c0_13] : memref<256x128xf32, #tpu.memory_space<vmem>>, vector<256x128xf32>
    %cst_14 = arith.constant dense<0.000000e+00> : vector<64x128xf32>
    %20 = tpu.matmul %17, %19, %cst_14 {dimension_numbers = #tpu.dot_dimension_numbers<[1], [0], [0], [1], [0, 0, 1, 1], [], []>} : vector<64x256xf32>, vector<256x128xf32>, vector<64x128xf32> -> vector<64x128xf32>
    %21 = arith.addf %18, %20 : vector<64x128xf32>
    %c0_15 = arith.constant 0 : index
    %c0_16 = arith.constant 0 : index
    %22 = vector.load %arg9[%c0_15, %c0_16] : memref<64x128xf32, #tpu.memory_space<vmem>>, vector<64x128xf32>
    tpu.vector_store %arg9[%c0_15, %c0_16], %21 {strides = array<i32>} : memref<64x128xf32, #tpu.memory_space<vmem>>, vector<64x128xf32>,
    %c1_i32 = arith.constant 1 : i32
    %23 = arith.cmpi eq, %arg1, %c1_i32 : i32
    %24 = arith.extui %23 : i1 to i32
    %c0_i32_17 = arith.constant 0 : i32
    %25 = arith.cmpi ne, %24, %c0_i32_17 : i32
    scf.if %25 {
      %c0_18 = arith.constant 0 : index
      %c0_19 = arith.constant 0 : index
      %26 = vector.load %arg9[%c0_18, %c0_19] : memref<64x128xf32, #tpu.memory_space<vmem>>, vector<64x128xf32>
      %c0_20 = arith.constant 0 : index
      %c0_21 = arith.constant 0 : index
      %27 = vector.load %arg8[%c0_20, %c0_21] : memref<1x128xf32, #tpu.memory_space<vmem>>, vector<1x128xf32>
      %28 = vector.broadcast %27 : vector<1x128xf32> to vector<64x128xf32>
      %29 = arith.addf %26, %28 : vector<64x128xf32>
      %c0_22 = arith.constant 0 : index
      %c0_23 = arith.constant 0 : index
      %30 = vector.load %arg9[%c0_22, %c0_23] : memref<64x128xf32, #tpu.memory_space<vmem>>, vector<64x128xf32>
      tpu.vector_store %arg9[%c0_22, %c0_23], %29 {strides = array<i32>} : memref<64x128xf32, #tpu.memory_space<vmem>>, vector<64x128xf32>,
    } else {
    }
    return
  }
  func.func @transform_0(%arg0: i32, %arg1: i32) -> (i32, i32) {
    %c0_i32 = arith.constant 0 : i32
    %c0_i32_0 = arith.constant 0 : i32
    return %arg0, %c0_i32 : i32, i32
  }
  func.func @transform_1(%arg0: i32, %arg1: i32) -> (i32, i32) {
    %c0_i32 = arith.constant 0 : i32
    %c0_i32_0 = arith.constant 0 : i32
    %c0_i32_1 = arith.constant 0 : i32
    return %c0_i32, %c0_i32_0 : i32, i32
  }
  func.func @transform_2(%arg0: i32, %arg1: i32) -> (i32, i32) {
    %c0_i32 = arith.constant 0 : i32
    %c0_i32_0 = arith.constant 0 : i32
    %c0_i32_1 = arith.constant 0 : i32
    return %c0_i32, %c0_i32_0 : i32, i32
  }
  func.func @transform_3(%arg0: i32, %arg1: i32) -> (i32, i32, i32) {
    %c0_i32 = arith.constant 0 : i32
    %c0_i32_0 = arith.constant 0 : i32
    %c0_i32_1 = arith.constant 0 : i32
    return %arg1, %c0_i32, %c0_i32_0 : i32, i32, i32
  }
  func.func @transform_4(%arg0: i32, %arg1: i32) -> (i32, i32) {
    %c0_i32 = arith.constant 0 : i32
    %c0_i32_0 = arith.constant 0 : i32
    return %c0_i32, %arg1 : i32, i32
  }
  func.func @transform_5(%arg0: i32, %arg1: i32) -> (i32, i32) {
    %c0_i32 = arith.constant 0 : i32
    %c0_i32_0 = arith.constant 0 : i32
    return %arg1, %c0_i32 : i32, i32
  }
  func.func @transform_6(%arg0: i32, %arg1: i32) -> (i32, i32) {
    %c0_i32 = arith.constant 0 : i32
    %c0_i32_0 = arith.constant 0 : i32
    %c0_i32_1 = arith.constant 0 : i32
    return %c0_i32, %c0_i32_0 : i32, i32
  }
  func.func @transform_7(%arg0: i32, %arg1: i32) -> (i32, i32) {
    %c0_i32 = arith.constant 0 : i32
    %c0_i32_0 = arith.constant 0 : i32
    return %arg0, %c0_i32 : i32, i32
  }
}

</mosaic_0001>

<bundles_post_ra>
// kernel: tpu_custom_call.1
= control target key start
LH: loop header
LB: loop body
LE: loop exit
PB: predicated region body
PF: predicated region fallthrough
CT: control target
= control target key end

     0   :  { %s2310_s0 = inlined_call_operand.hbm [shape: f32[128,128], index: 0, kind: input, shape index: {}]   ;;  %s2311_s1 = inlined_call_operand.vmem [shape: f32[1,128], index: 1, kind: input, shape index: {}]   ;;  %s2312_s2 = inlined_call_operand.vmem [shape: f32[1,128], index: 2, kind: input, shape index: {}]   ;;  %s2313_s3 = inlined_call_operand.hbm [shape: f32[2,128,256], index: 3, kind: input, shape index: {}]   ;;  %s2314_s4 = inlined_call_operand.vmem [shape: f32[1,512], index: 4, kind: input, shape index: {}]   ;;  %s2315_s5 = inlined_call_operand.hbm [shape: f32[512,128], index: 5, kind: input, shape index: {}]   ;;  %s2316_s6 = inlined_call_operand.vmem [shape: f32[1,128], index: 6, kind: input, shape index: {}]   ;;  %s2317_s7 = inlined_call_operand.hbm [shape: f32[128,128], index: 7, kind: output, shape index: {}]  }
   0x1   :  { %2332 = sst [smem:[#allocation20_spill]] %s2310_s0 }
   0x2   :  { %2333 = sst [smem:[#allocation21_spill]] %s2311_s1 }
   0x3   :  { %2334 = sst [smem:[#allocation22_spill]] %s2312_s2 }
   0x4   :  { %2335 = sst [smem:[#allocation23_spill]] %s2313_s3 }
   0x5   :  { %2336 = sst [smem:[#allocation24_spill]] %s2316_s6 }
   0x6   :  { %2337 = sst [smem:[#allocation25_spill]] %s2317_s7 }
   0x7   :  { %12 = vsyncpa [#allocation4], 0 }
   0x8   :  { %14 = vsyncpa [#allocation4 + $0x1], 0 }
   0x9   :  { %15 = vsyncpa [#allocation7], 0 }
   0xa   :  { %17 = vsyncpa [#allocation7 + $0x1], 0 }
   0xb   :  { %18 = vsyncpa [#allocation5], 0 }
   0xc   :  { %20 = vsyncpa [#allocation5 + $0x1], 0  ;;  %s1737_s24 = smov 0   ;;  %s1739_s25 = smov 0  }
   0xd   :  { %s1741_s26 = smov 0   ;;  %s1743_s27 = smov 0  }
   0xe   :  { %s1745_s28 = smov 0   ;;  %s1747_s29 = smov 0  }
   0xf   :  { %s1749_s30 = smov 0   ;;  %s1751_s8 = smov 0  }
  0x10   :  { %s1753_s9 = smov 0   ;;  %s1755_s10 = smov 0  }
  0x11   :  { %s1757_s11 = smov 0  }
  0x12 LB: > { %2338 = sst [smem:[#allocation13_spill]] %s1651_s26  ;;  %s1791_s12 = sadd.s32 4294967295, %s1683_s11   ;;  %s1683_s11 = sphi %s1757_s11, %s26_s11   ;;  %s1679_s10 = sphi %s1755_s10, %s2386_s10   ;;  %s1675_s9 = sphi %s1753_s9, %s2377_s9   ;;  %s1671_s8 = sphi %s1751_s8, %s2385_s8   ;;  %s1667_s30 = sphi %s1749_s30, %s2376_s30   ;;  %s1663_s29 = sphi %s1747_s29, %s2384_s29   ;;  %s1659_s28 = sphi %s1745_s28, %s2383_s28   ;;  %s1655_s27 = sphi %s1743_s27, %s2382_s27   ;;  %s1651_s26 = sphi %s1741_s26, %s2381_s26   ;;  %s1647_s25 = sphi %s1739_s25, %s2380_s25   ;;  %s1643_s24 = sphi %s1737_s24, %s2379_s24  }
  0x13   : > { %2339 = sst [smem:[#allocation14_spill]] %s1655_s27  ;;  %s35_s13 = sadd.s32 1, %s1675_s9 }
  0x14   : > { %2340 = sst [smem:[#allocation15_spill]] %s1671_s8  ;;  %p1794_p0 = scmp.ge.s32.totalorder %s35_s13, 2 }
  0x15   : > { %2341 = sst [smem:[#allocation16_spill]] %s1675_s9  ;;  %p2324_p1 = scmp.eq.s32.totalorder %s1683_s11, 0 }
  0x16   : > { %p2323_p2 = scmp.eq.s32.totalorder %s1791_s12, 0  ;;  %s113_s15 = sadd.s32 1, %s1651_s26 }
  0x17   : > { %s2388_s13 = smov (%p1794_p0, %s35_s13), 0  ;;  %p120_p3 = scmp.ne.s32.totalorder %s1651_s26, %s1647_s25 }
  0x18   : > { %2343 = sst [smem:[#allocation17_spill]] %s2388_s13  ;;  %p126_p4 = scmp.ne.s32.totalorder %s1647_s25, %s1643_s24 }
  0x19   : > { %s110_s16 = ssub.s32 %s1675_s9, %s2388_s13  ;;  %p122_p6 = por %p120_p3, %p2324_p1 }
  0x1a   : > { %p111_p5 = scmp.eq.s32.totalorder %s110_s16, 0  ;;  %p1814_p7 = por %p126_p4, %p2323_p2 }
  0x1b   : > { %p2322_p8 = scmp.lt.s32.totalorder %s1683_s11, 4  ;;  %s279_s19 = sand.u32 1, %s1683_s11  }
  0x1c   : > { %s2344_s17 = scalar_select %p1814_p7, 1, 0 }
  0x1d   : > { %s1820_s18 = scalar_select %p111_p5, %s1651_s26, %s113_s15  }
  0x1e   : > { %s281_s20 = sand.u32 1, %s1651_s26   ;;  %s2320_s22 = sshll.u32 %s1675_s9, 12 }
  0x1f   : > { %2345 = sst [smem:[#allocation18_spill]] %s1820_s18  ;;  %s1824_s21 = sshll.u32 %s281_s20, 8 }
  0x20   : > { %s2346_s3 = sld [smem:[#allocation23_spill]]  ;;  %s283_s13 = scalar_lea.vmem [#allocation6], %s1824_s21 }
  0x21   : > { %s290_s7 = sshll.u32 %s283_s13, 4  ;;  %p1839_p9 = pnand %p2322_p8, %p122_p6  ;;  %s1835_s7 = int_to_ptr.vmem [resolvable:$true] %s290_s7 }
  0x22   : > { %s1843_s20 = scalar_lea.sflag [#allocation7], %s279_s19 }
  0x23   : > { %p2329_p11 = pneg %p1839_p9 }
  0x26   : > { %s1832_s16 = scalar_lea.hbm %s2346_s3, %s2320_s22  ;;  %s1472_s22 = scalar_lea.hbm %s2346_s3, 8192 }
  0x27   : > { %s1467_s23 = scalar_lea.hbm %s1832_s16, 4096  ;;  %p1473_p3 = scmp.lt.u32.totalorder %s1832_s16, %s2346_s3 }
  0x28   : > { %p1468_p10 = scmp.ne.s32.totalorder %s1832_s16, %s1467_s23  ;;  %p1474_p4 = scmp.lt.u32.totalorder %s1472_s22, %s1467_s23 }
  0x29   : > { %p1476_p6 = scmp.lt.u32.totalorder %s1467_s23, %s1832_s16 }
  0x2a   : > { %p1470_p12 = pnand %p2329_p11, %p1468_p10  ;;  %p1475_p5 = por %p1474_p4, %p1473_p3 }
  0x2c   : > { %p1471_p13 = pneg %p1470_p12  ;;  %p1477_p8 = por %p1476_p6, %p1475_p5 }
  0x2e   : > { %p1478_p2 = pnand %p1477_p8, %p1471_p13 }
  0x30   : > { %1481 = shalt.err (!%p1478_p2)
}
  0x31   : > { %s1482_s19 = scalar_lea.vmem %s1835_s7, 4096  ;;  %s1685_s13 = smov [#allocation6]  }
  0x32   : > { %p1483_p10 = scmp.ne.s32.totalorder %s1835_s7, %s1482_s19  ;;  %s1487_s24 = sshll.u32 %s1685_s13, 4  ;;  %s1488_s24 = int_to_ptr.vmem [resolvable:$false] %s1487_s24 }
  0x33   : > { %s1489_s26 = scalar_lea.vmem %s1488_s24, 8192  ;;  %p1490_p7 = scmp.lt.s32.totalorder %s1835_s7, %s1488_s24 }
  0x34   : > { %p1485_p12 = pnand %p1483_p10, %p2329_p11  ;;  %p1491_p3 = scmp.lt.s32.totalorder %s1489_s26, %s1482_s19 }
  0x36   : > { %p1486_p1 = pneg %p1485_p12  ;;  %p1492_p4 = por %p1491_p3, %p1490_p7 }
  0x38   : > { %p1493_p5 = pnand %p1492_p4, %p1486_p1 }
  0x3a   : > { %1496 = shalt.err (!%p1493_p5)
}
  0x3b   : > { %s1686_s18 = smov 256   ;;  %s1687_s22 = smov 16  }
  0x3c   : > { %1313 = dma.hbm_to_vmem [thread:$0]  (!%p1839_p9), %s1832_s16, 4096, %s1835_s7, %s1843_s20, %s1686_s18, %s1686_s18, %s1687_s22  }
  0x3d   : > { %s2348_s23 = sshll.u32 %s1675_s9, 12  ;;  %s312_s26 = scalar_lea.vmem [#allocation8], %s1824_s21 }
  0x3e   : > { %s1876_s24 = scalar_lea.hbm %s2315_s5, %s2348_s23  ;;  %s319_s3 = sshll.u32 %s312_s26, 4  ;;  %s1879_s3 = int_to_ptr.vmem [resolvable:$true] %s319_s3 }
  0x3f   : > { %p1159_p1 = scmp.ge.s32.totalorder %s1683_s11, 1  ;;  %p327_p2 = scmp.lt.s32.totalorder %s1683_s11, 5 }
  0x40   : > { %s1147_s7 = sadd.s32 4294967294, %s1683_s11   ;;  %s38_s16 = sadd.s32 1, %s1679_s10 }
  0x41   : > { %p1883_p7 = pnand %p1159_p1, %p327_p2  ;;  %s2390_s16 = smov (!%p1794_p0, %s38_s16), %s1679_s10 }
  0x42   : > { %s45_s18 = sadd.s32 1, %s1663_s29  ;;  %p52_p8 = scmp.ne.s32.totalorder %s1663_s29, %s1659_s28 }
  0x43   : > { %s2349_s8 = scalar_select %p1883_p7, 1, 0 }
  0x44   : > { %p40_p13 = scmp.ge.s32.totalorder %s2390_s16, 2  ;;  %p58_p6 = scmp.ne.s32.totalorder %s1659_s28, %s1655_s27 }
  0x45   : > { %p2350_p10 = scmp.eq.s32.totalorder %s1683_s11, 0  ;;  %p223_p3 = scmp.eq.s32.totalorder %s1791_s12, 3 }
  0x46   : > { %s2392_s16 = smov (%p40_p13, %s2390_s16), 0  ;;  %p2353_p4 = scmp.eq.s32.totalorder %s1791_s12, 0 }
  0x47   : > { %p1899_p12 = por %p2350_p10, %p52_p8  ;;  %2352 = sst [smem:[#allocation19_spill]] %s2392_s16 }
  0x48   : > { %p1908_p5 = por %p2353_p4, %p58_p6  ;;  %p1912_p0 = por %p223_p3, %p52_p8 }
  0x49   : > { %s42_s23 = ssub.s32 %s1679_s10, %s2392_s16  ;;  %p229_p1 = scmp.eq.s32.totalorder %s1147_s7, 3 }
  0x4a   : > { %s2354_s14 = scalar_select %p1908_p5, 1, 0 }
  0x4b   : > { %s2355_s22 = scalar_select %p1912_p0, 1, 0 }
  0x4c   : > { %p43_p2 = scmp.eq.s32.totalorder %s42_s23, 0  ;;  %s258_s19 = sand.u32 1, %s1663_s29  }
  0x4d   : > { %p1919_p10 = por %p229_p1, %p58_p6  ;;  %s1150_s9 = sshll.u32 %s258_s19, 6 }
  0x4e   : > { %s1924_s26 = scalar_select %p43_p2, %s1663_s29, %s45_s18  }
  0x4f   : > { %s2356_s13 = scalar_select %p1919_p10, 1, 0 }
  0x50   : > { %s1175_s27 = sshll.u32 %s1679_s10, 10  ;;  %s2357_s0 = sld [smem:[#allocation20_spill]] }
  0x51   : > { %s262_s7 = scalar_lea.vmem [#allocation3], %s1150_s9  ;;  %p2358_p8 = scmp.lt.s32.totalorder %s1683_s11, 4 }
  0x52   : > { %s269_s23 = sshll.u32 %s262_s7, 4  ;;  %s1942_s18 = scalar_lea.sflag [#allocation4], %s258_s19  ;;  %s1940_s23 = int_to_ptr.vmem [resolvable:$true] %s269_s23 }
  0x53   : > { %p1936_p13 = pnand %p2358_p8, %p1899_p12 }
  0x55   : > { %p1499_p3 = pneg %p1936_p13 }
  0x56   : > { %s1930_s1 = scalar_lea.hbm %s2357_s0, %s1175_s27  ;;  %s1502_s9 = scalar_lea.hbm %s2357_s0, 2048 }
  0x57   : > { %s1497_s2 = scalar_lea.hbm %s1930_s1, 1024  ;;  %p1503_p12 = scmp.lt.u32.totalorder %s1930_s1, %s2357_s0 }
  0x58   : > { %p1498_p6 = scmp.ne.s32.totalorder %s1930_s1, %s1497_s2  ;;  %p1504_p2 = scmp.lt.u32.totalorder %s1502_s9, %s1497_s2 }
  0x59   : > { %p1506_p11 = scmp.lt.u32.totalorder %s1497_s2, %s1930_s1 }
  0x5a   : > { %p1500_p4 = pnand %p1499_p3, %p1498_p6  ;;  %p1505_p8 = por %p1504_p2, %p1503_p12 }
  0x5c   : > { %p1501_p1 = pneg %p1500_p4  ;;  %p1507_p10 = por %p1506_p11, %p1505_p8 }
  0x5e   : > { %p1508_p0 = pnand %p1507_p10, %p1501_p1 }
  0x60   : > { %1511 = shalt.err (!%p1508_p0)
}
  0x61   : > { %s1512_s19 = scalar_lea.vmem %s1940_s23, 1024  ;;  %s1688_s6 = smov [#allocation3]  }
  0x62   : > { %p1513_p6 = scmp.ne.s32.totalorder %s1940_s23, %s1512_s19  ;;  %s1517_s27 = sshll.u32 %s1688_s6, 4  ;;  %s1518_s27 = int_to_ptr.vmem [resolvable:$false] %s1517_s27 }
  0x63   : > { %s1519_s21 = scalar_lea.vmem %s1518_s27, 2048  ;;  %p1520_p7 = scmp.lt.s32.totalorder %s1940_s23, %s1518_s27 }
  0x64   : > { %p1515_p4 = pnand %p1513_p6, %p1499_p3  ;;  %p1521_p12 = scmp.lt.s32.totalorder %s1519_s21, %s1512_s19 }
  0x66   : > { %p1516_p5 = pneg %p1515_p4  ;;  %p1522_p2 = por %p1521_p12, %p1520_p7 }
  0x68   : > { %p1523_p11 = pnand %p1522_p2, %p1516_p5 }
  0x6a   : > { %1526 = shalt.err (!%p1523_p11)
}
  0x6b   : > { %s1689_s2 = smov 128   ;;  %s1690_s9 = smov 8  }
  0x6c   : > { %1310 = dma.hbm_to_vmem [thread:$0]  (!%p1936_p13), %s1930_s1, 1024, %s1940_s23, %s1942_s18, %s1689_s2, %s1689_s2, %s1690_s9  }
  0x6d   : > { %s1527_s7 = scalar_lea.hbm %s1876_s24, 4096  ;;  %p2360_p5 = pneg %p1839_p9 }
  0x6e   : > { %p1528_p7 = scmp.ne.s32.totalorder %s1876_s24, %s1527_s7  ;;  %s1532_s27 = scalar_lea.hbm %s2315_s5, 8192 }
  0x6f   : > { %p1533_p3 = scmp.lt.u32.totalorder %s1876_s24, %s2315_s5  ;;  %p1534_p1 = scmp.lt.u32.totalorder %s1532_s27, %s1527_s7 }
  0x70   : > { %p1530_p0 = pnand %p1528_p7, %p2360_p5  ;;  %p1536_p6 = scmp.lt.u32.totalorder %s1527_s7, %s1876_s24 }
  0x71   : > { %p1535_p8 = por %p1534_p1, %p1533_p3 }
  0x72   : > { %p1531_p10 = pneg %p1530_p0 }
  0x73   : > { %p1537_p4 = por %p1536_p6, %p1535_p8 }
  0x75   : > { %p1538_p12 = pnand %p1537_p4, %p1531_p10 }
  0x77   : > { %1541 = shalt.err (!%p1538_p12)
}
  0x78   : > { %s1542_s1 = scalar_lea.vmem %s1879_s3, 4096  ;;  %p2361_p2 = pmov %p2360_p5 }
  0x79   : > { %p1543_p13 = scmp.ne.s32.totalorder %s1879_s3, %s1542_s1  ;;  %s1691_s16 = smov [#allocation8]  }
  0x7a   : > { %s1547_s23 = sshll.u32 %s1691_s16, 4  ;;  %s1548_s23 = int_to_ptr.vmem [resolvable:$false] %s1547_s23 }
  0x7b   : > { %p1545_p11 = pnand %p1543_p13, %p2361_p2  ;;  %s1549_s0 = scalar_lea.vmem %s1548_s23, 8192 }
  0x7c   : > { %p1550_p5 = scmp.lt.s32.totalorder %s1879_s3, %s1548_s23  ;;  %p1551_p0 = scmp.lt.s32.totalorder %s1549_s0, %s1542_s1 }
  0x7d   : > { %p1546_p7 = pneg %p1545_p11 }
  0x7e   : > { %p1552_p3 = por %p1551_p0, %p1550_p5 }
  0x80   : > { %p1553_p1 = pnand %p1552_p3, %p1546_p7 }
  0x82   : > { %1556 = shalt.err (!%p1553_p1)
}
  0x83   : > { %1316 = dma.hbm_to_vmem [thread:$0]  (!%p1839_p9), %s1876_s24, 4096, %s1879_s3, %s1843_s20, %s1689_s2, %s1689_s2, %s1690_s9  }
  0x84   : > { %p2362_p10 = scmp.ne.s32.totalorder %s2349_s8, 0 }
  0x85   : > { %s2003_s18 = sand.u32 (!%p2362_p10), 1, %s1659_s28   ;;  %p2363_p8 = scmp.ne.s32.totalorder (!%p2362_p10), %s2354_s14, 0 }
  0x86   : > { %331 = sbr.rel (%p2362_p10) target bundleno = 1031 (0x407), region = 48  ;;  %s1160_s7 = sshll.u32 (!%p2362_p10), %s2003_s18, 6 }
  0x87   : > { %s334_s19 = scalar_lea.sflag (!%p2362_p10), [#allocation4], %s2003_s18  ;;  %s2007_s6 = scalar_lea.vmem (!%p2362_p10), [#allocation3], %s1160_s7 }
  0x8d   : > { %1630 = dma.done.wait (%p2363_p8), %s334_s19, 1024  }
  0x8e   : > { %1632 = vsyncadd (%p2363_p8), %s334_s19, 4294966272  ;;  %s342_s3 = sand.u32 1, %s1791_s12   ;;  %s344_s8 = sand.u32 1, %s1647_s25  }
  0x8f   : > { %s1161_s15 = sshll.u32 %s344_s8, 8  ;;  %s343_s20 = scalar_lea.sflag [#allocation7], %s342_s3 }
  0x90   : > { %s2015_s24 = scalar_lea.vmem [#allocation6], %s1161_s15  ;;  %p2364_p9 = scmp.ne.s32.totalorder %s2344_s17, 0 }
  0x92   : > { %1634 = dma.done.wait (%p2364_p9), %s343_s20, 8192  }
  0x93   : > { %1636 = vsyncadd (%p2364_p9), %s343_s20, 4294959104  ;;  %s1164_s2 = sshll.u32 %s1667_s30, 1  ;;  %s2028_s27 = scalar_lea.vmem [#allocation8], %s1161_s15 }
  0x94   : > { %p402_p6 = scmp.lt.s32.totalorder %s1164_s2, 3  ;;  %s2030_s21 = scalar_lea.vmem [#allocation9], %s1160_s7 }
  0x95   : > { %p1165_p4 = scmp.ne.s32.totalorder %s1667_s30, 0 }
  0x96   : > { %s2394_s2 = smov (!%p402_p6, %s1164_s2), 3  ;;  %v412_v0 = vld [vmem:[%s2007_s6] sm:$0xff] (!%p1165_p4)  ;;  %v414_v1 = vld [vmem:[%s2007_s6 + $0x10] sm:$0xff] (!%p1165_p4)  ;;  %v413_v2 = vld [vmem:[%s2007_s6 + $0x8] sm:$0xff] (!%p1165_p4)  ;;  %v1692_v40 = vmov (!%p1165_p4), 0.0   ;;  %s2365_s16 = sld [smem:[#allocation21_spill]] (!%p1165_p4) }
  0x97   : > { %s404_s12 = scalar_lea.vmem %s2314_s4, %s2394_s2  ;;  %411 = sbr.rel (%p1165_p4) target bundleno = 479 (0x1df), region = 64  ;;  %420 = vadd.xlane.f32.xlu0 (!%p1165_p4), %v412_v0  ;;  %424 = vadd.xlane.f32.xlu1 (!%p1165_p4), %v414_v1  ;;  %v415_v3 = vld [vmem:[%s2007_s6 + $0x18] sm:$0xff] (!%p1165_p4)  ;;  %v416_v4 = vld [vmem:[%s2007_s6 + $0x20] sm:$0xff] (!%p1165_p4)  ;;  %v417_v5 = vld [vmem:[%s2007_s6 + $0x28] sm:$0xff] (!%p1165_p4)  ;;  %547 = vst [vmem:[%s2030_s21] sm:$0xff] (!%p1165_p4), %v1692_v40 }
  0x98   : > { %v418_v6 = vld [vmem:[%s2007_s6 + $0x30] sm:$0xff] (!%p1165_p4)  ;;  %v419_v7 = vld [vmem:[%s2007_s6 + $0x38] sm:$0xff] (!%p1165_p4)  ;;  %548 = vst [vmem:[%s2030_s21 + $0x8] sm:$0xff] (!%p1165_p4), %v1692_v40  ;;  %549 = vst [vmem:[%s2030_s21 + $0x10] sm:$0xff] (!%p1165_p4), %v1692_v40  ;;  %s2366_s7 = sld [smem:[#allocation22_spill]] (!%p1165_p4) }
  0x99   : > { %550 = vst [vmem:[%s2030_s21 + $0x18] sm:$0xff] (!%p1165_p4), %v1692_v40  ;;  %551 = vst [vmem:[%s2030_s21 + $0x20] sm:$0xff] (!%p1165_p4), %v1692_v40 }
  0x9a   : > { %552 = vst [vmem:[%s2030_s21 + $0x28] sm:$0xff] (!%p1165_p4), %v1692_v40  ;;  %553 = vst [vmem:[%s2030_s21 + $0x30] sm:$0xff] (!%p1165_p4), %v1692_v40 }
  0x9b   : > { %422 = vadd.xlane.f32.xlu0 (!%p1165_p4), %v413_v2  ;;  %426 = vadd.xlane.f32.xlu1 (!%p1165_p4), %v415_v3  ;;  %554 = vst [vmem:[%s2030_s21 + $0x38] sm:$0xff] (!%p1165_p4), %v1692_v40 }
  0x9c   : > { %v1166_v61 = vld [vmem:[%s2365_s16] ss:$0 sm:$0xff] (!%p1165_p4) }
  0x9f   : > { %428 = vadd.xlane.f32.xlu0 %v416_v4  ;;  %430 = vadd.xlane.f32.xlu1 %v417_v5 }
  0xa3   : > { %432 = vadd.xlane.f32.xlu0 %v418_v6  ;;  %434 = vadd.xlane.f32.xlu1 %v419_v7 }
 0x124   : > { %v421_v8 = vpop.xlane.xlu0 %420  ;;  %v425_v9 = vpop.xlane.xlu1 %424 }
 0x125   : > { %v437_v10 = vmul.f32 0.0078125, %v421_v8  ;;  %v439_v11 = vmul.f32 0.0078125, %v425_v9 }
 0x127   : > { %v2041_v12 = vsub.f32 %v412_v0, %v437_v10  ;;  %v2043_v13 = vsub.f32 %v414_v1, %v439_v11 }
 0x128   : > { %v423_v14 = vpop.xlane.xlu0 %422  ;;  %v427_v15 = vpop.xlane.xlu1 %426 }
 0x129   : > { %v438_v16 = vmul.f32 0.0078125, %v423_v14  ;;  %v453_v17 = vmul.f32 %v2041_v12, %v2041_v12  ;;  %v440_v18 = vmul.f32 0.0078125, %v427_v15  ;;  %v455_v21 = vmul.f32 %v2043_v13, %v2043_v13 }
 0x12b   : > { %v2047_v19 = vsub.f32 %v413_v2, %v438_v16  ;;  %461 = vadd.xlane.f32.xlu0 %v453_v17  ;;  %v2049_v20 = vsub.f32 %v415_v3, %v440_v18  ;;  %v1167_v2 = vld [vmem:[%s2366_s7] ss:$0 sm:$0xff] }
 0x12c   : > { %v429_v22 = vpop.xlane.xlu0 %428  ;;  %v431_v23 = vpop.xlane.xlu1 %430 }
 0x12d   : > { %v441_v24 = vmul.f32 0.0078125, %v429_v22  ;;  %v454_v25 = vmul.f32 %v2047_v19, %v2047_v19  ;;  %v442_v26 = vmul.f32 0.0078125, %v431_v23  ;;  %v456_v29 = vmul.f32 %v2049_v20, %v2049_v20 }
 0x12f   : > { %v2055_v27 = vsub.f32 %v416_v4, %v441_v24  ;;  %465 = vadd.xlane.f32.xlu0 %v455_v21  ;;  %463 = vadd.xlane.f32.xlu1 %v454_v25  ;;  %v2057_v28 = vsub.f32 %v417_v5, %v442_v26 }
 0x130   : > { %v433_v30 = vpop.xlane.xlu0 %432  ;;  %v435_v31 = vpop.xlane.xlu1 %434 }
 0x131   : > { %v443_v32 = vmul.f32 0.0078125, %v433_v30  ;;  %v457_v33 = vmul.f32 %v2055_v27, %v2055_v27  ;;  %v444_v34 = vmul.f32 0.0078125, %v435_v31  ;;  %v458_v37 = vmul.f32 %v2057_v28, %v2057_v28 }
 0x133   : > { %v2063_v35 = vsub.f32 %v418_v6, %v443_v32  ;;  %467 = vadd.xlane.f32.xlu1 %v456_v29  ;;  %469 = vadd.xlane.f32.xlu0 %v457_v33  ;;  %v2065_v36 = vsub.f32 %v419_v7, %v444_v34 }
 0x135   : > { %v459_v38 = vmul.f32 %v2063_v35, %v2063_v35  ;;  %v460_v39 = vmul.f32 %v2065_v36, %v2065_v36 }
 0x137   : > { %471 = vadd.xlane.f32.xlu1 %v458_v37  ;;  %473 = vadd.xlane.f32.xlu0 %v459_v38 }
 0x13b   : > { %475 = vadd.xlane.f32.xlu1 %v460_v39 }
 0x1b8   : > { %v462_v41 = vpop.xlane.xlu0 %461 }
 0x1b9   : > { %v477_v42 = vmul.f32 0.0078125, %v462_v41 }
 0x1bb   : > { %v485_v43 = vadd.f32 1e-05, %v477_v42 }
 0x1bc   : > { %v464_v44 = vpop.xlane.xlu1 %463  ;;  %v466_v45 = vpop.xlane.xlu0 %465 }
 0x1bd   : > { %1419 = vrsqrt.f32 %v485_v43  ;;  %v478_v46 = vmul.f32 0.0078125, %v464_v44  ;;  %v479_v47 = vmul.f32 0.0078125, %v466_v45 }
 0x1bf   : > { %v486_v48 = vadd.f32 1e-05, %v478_v46  ;;  %v487_v49 = vadd.f32 1e-05, %v479_v47 }
 0x1c0   : > { %v468_v50 = vpop.xlane.xlu1 %467  ;;  %v470_v51 = vpop.xlane.xlu0 %469 }
 0x1c1   : > { %1421 = vrsqrt.f32 %v486_v48  ;;  %v480_v52 = vmul.f32 0.0078125, %v468_v50  ;;  %v481_v53 = vmul.f32 0.0078125, %v470_v51 }
 0x1c2   : > { %1423 = vrsqrt.f32 %v487_v49 }
 0x1c3   : > { %v488_v54 = vadd.f32 1e-05, %v480_v52  ;;  %v489_v55 = vadd.f32 1e-05, %v481_v53 }
 0x1c4   : > { %v472_v56 = vpop.xlane.xlu1 %471  ;;  %v474_v57 = vpop.xlane.xlu0 %473 }
 0x1c5   : > { %1425 = vrsqrt.f32 %v488_v54  ;;  %v482_v58 = vmul.f32 0.0078125, %v472_v56  ;;  %v483_v59 = vmul.f32 0.0078125, %v474_v57 }
 0x1c6   : > { %1427 = vrsqrt.f32 %v489_v55 }
 0x1c7   : > { %v1420_v60 = vpop.eup %1419  ;;  %v490_v62 = vadd.f32 1e-05, %v482_v58  ;;  %v491_v63 = vadd.f32 1e-05, %v483_v59 }
 0x1c8   : > { %v501_v0 = vmul.f32 %v1420_v60, %v2041_v12  ;;  %v476_v1 = vpop.xlane.xlu1 %475 }
 0x1c9   : > { %1429 = vrsqrt.f32 %v490_v62  ;;  %v484_v3 = vmul.f32 0.0078125, %v476_v1 }
 0x1ca   : > { %v516_v4 = vmul.f32 %v1166_v61, %v501_v0  ;;  %1431 = vrsqrt.f32 %v491_v63 }
 0x1cb   : > { %v1422_v5 = vpop.eup %1421  ;;  %v492_v6 = vadd.f32 1e-05, %v484_v3 }
 0x1cc   : > { %v1424_v7 = vpop.eup %1423  ;;  %v531_v8 = vadd.f32 %v1167_v2, %v516_v4  ;;  %v502_v9 = vmul.f32 %v1422_v5, %v2047_v19 }
 0x1cd   : > { %v503_v10 = vmul.f32 %v1424_v7, %v2043_v13  ;;  %1433 = vrsqrt.f32 %v492_v6 }
 0x1ce   : > { %539 = vst [vmem:[#allocation2] sm:$0xff] %v531_v8  ;;  %v517_v11 = vmul.f32 %v1166_v61, %v502_v9 }
 0x1cf   : > { %v1426_v12 = vpop.eup %1425  ;;  %v518_v14 = vmul.f32 %v1166_v61, %v503_v10 }
 0x1d0   : > { %v1428_v15 = vpop.eup %1427  ;;  %v532_v16 = vadd.f32 %v1167_v2, %v517_v11  ;;  %v504_v17 = vmul.f32 %v1426_v12, %v2049_v20 }
 0x1d1   : > { %v533_v18 = vadd.f32 %v1167_v2, %v518_v14  ;;  %v505_v21 = vmul.f32 %v1428_v15, %v2055_v27 }
 0x1d2   : > { %540 = vst [vmem:[#allocation2 + $0x8] sm:$0xff] %v532_v16  ;;  %v519_v22 = vmul.f32 %v1166_v61, %v504_v17 }
 0x1d3   : > { %v1430_v23 = vpop.eup %1429  ;;  %541 = vst [vmem:[#allocation2 + $0x10] sm:$0xff] %v533_v18  ;;  %v520_v24 = vmul.f32 %v1166_v61, %v505_v21 }
 0x1d4   : > { %v1432_v19 = vpop.eup %1431  ;;  %v534_v25 = vadd.f32 %v1167_v2, %v519_v22  ;;  %v506_v13 = vmul.f32 %v1430_v23, %v2057_v28 }
 0x1d5   : > { %v535_v26 = vadd.f32 %v1167_v2, %v520_v24  ;;  %v507_v29 = vmul.f32 %v1432_v19, %v2063_v35 }
 0x1d6   : > { %542 = vst [vmem:[#allocation2 + $0x18] sm:$0xff] %v534_v25  ;;  %v521_v30 = vmul.f32 %v1166_v61, %v506_v13 }
 0x1d7   : > { %v1434_v31 = vpop.eup %1433  ;;  %543 = vst [vmem:[#allocation2 + $0x20] sm:$0xff] %v535_v26  ;;  %v522_v20 = vmul.f32 %v1166_v61, %v507_v29 }
 0x1d8   : > { %v536_v32 = vadd.f32 %v1167_v2, %v521_v30  ;;  %v508_v27 = vmul.f32 %v1434_v31, %v2065_v36 }
 0x1d9   : > { %v537_v33 = vadd.f32 %v1167_v2, %v522_v20 }
 0x1da   : > { %544 = vst [vmem:[#allocation2 + $0x28] sm:$0xff] %v536_v32  ;;  %v523_v34 = vmul.f32 %v1166_v61, %v508_v27 }
 0x1db   : > { %545 = vst [vmem:[#allocation2 + $0x30] sm:$0xff] %v537_v33 }
 0x1dc   : > { %v538_v37 = vadd.f32 %v1167_v2, %v523_v34 }
 0x1de   : > { %546 = vst [vmem:[#allocation2 + $0x38] sm:$0xff] %v538_v37 }
 0x1df PF: > { %v564_v28 = vld [vmem:[%s2015_s24 + $0x8] sm:$0xff]  ;;  %v566_v35 = vld [vmem:[%s2015_s24 + $0x18] sm:$0xff]  ;;  %v563_v36 = vld [vmem:[%s2015_s24] sm:$0xff]  ;;  %v1693_v42 = vmov 0.0   ;;  %p1168_p12 = scmp.ne.s32.totalorder %s1667_s30, 1 }
 0x1e0   : > { %v1235_v38 = vpack.c.bf16 %v566_v35, %v564_v28  ;;  %v565_v39 = vld [vmem:[%s2015_s24 + $0x10] sm:$0xff]  ;;  %v568_v40 = vld [vmem:[%s2015_s24 + $0x28] sm:$0xff]  ;;  %v570_v41 = vld [vmem:[%s2015_s24 + $0x38] sm:$0xff]  ;;  %671 = vmatprep.mubr.f32.mxu0 %v1693_v42  ;;  %s2367_s15 = sld [smem:[#allocation24_spill]] (!%p1168_p12) }
 0x1e1   : > { %v1237_v43 = vpack.c.bf16 %v565_v39, %v563_v36  ;;  %v1239_v44 = vpack.c.bf16 %v570_v41, %v568_v40  ;;  %v567_v45 = vld [vmem:[%s2015_s24 + $0x20] sm:$0xff]  ;;  %v569_v46 = vld [vmem:[%s2015_s24 + $0x30] sm:$0xff]  ;;  %v572_v47 = vld [vmem:[%s2015_s24 + $0x48] sm:$0xff] }
 0x1e2   : > { %1236 = vmatprep.subr.bf16.mxu0 %v1235_v38  ;;  %v574_v48 = vld [vmem:[%s2015_s24 + $0x58] sm:$0xff]  ;;  %v1241_v49 = vpack.c.bf16 %v569_v46, %v567_v45  ;;  %v571_v51 = vld [vmem:[%s2015_s24 + $0x40] sm:$0xff]  ;;  %v573_v52 = vld [vmem:[%s2015_s24 + $0x50] sm:$0xff] }
 0x1e3   : > { %1238 = vmatpush1.bf16.msra.mxu0 %v1237_v43  ;;  %v1243_v50 = vpack.c.bf16 %v574_v48, %v572_v47  ;;  %v576_v53 = vld [vmem:[%s2015_s24 + $0x68] sm:$0xff]  ;;  %v578_v54 = vld [vmem:[%s2015_s24 + $0x78] sm:$0xff]  ;;  %v1245_v55 = vpack.c.bf16 %v573_v52, %v571_v51  ;;  %v575_v57 = vld [vmem:[%s2015_s24 + $0x60] sm:$0xff] }
 0x1e4   : > { %1240 = vmatprep.subr.bf16.mxu0 %v1239_v44  ;;  %v1247_v56 = vpack.c.bf16 %v578_v54, %v576_v53  ;;  %v577_v58 = vld [vmem:[%s2015_s24 + $0x70] sm:$0xff]  ;;  %v580_v59 = vld [vmem:[%s2015_s24 + $0x88] sm:$0xff]  ;;  %v582_v60 = vld [vmem:[%s2015_s24 + $0x98] sm:$0xff] }
 0x1e5   : > { %v1249_v61 = vpack.c.bf16 %v577_v58, %v575_v57  ;;  %v579_v62 = vld [vmem:[%s2015_s24 + $0x80] sm:$0xff]  ;;  %v581_v63 = vld [vmem:[%s2015_s24 + $0x90] sm:$0xff]  ;;  %v584_v0 = vld [vmem:[%s2015_s24 + $0xa8] sm:$0xff]  ;;  %v1251_v1 = vpack.c.bf16 %v582_v60, %v580_v59 }
 0x1e6   : > { %v586_v2 = vld [vmem:[%s2015_s24 + $0xb8] sm:$0xff]  ;;  %v824_v3 = vld [vmem:[%s2028_s27 + $0x80] sm:$0xff]  ;;  %v825_v4 = vld [vmem:[%s2028_s27 + $0x88] sm:$0xff]  ;;  %v1253_v14 = vpack.c.bf16 %v581_v63, %v579_v62 }
 0x1e7   : > { %1242 = vmatpush1.bf16.msra.mxu0 %v1241_v49  ;;  %v1267_v5 = vpack.c.bf16 %v825_v4, %v824_v3  ;;  %v808_v6 = vld [vmem:[%s2028_s27] sm:$0xff]  ;;  %v809_v7 = vld [vmem:[%s2028_s27 + $0x8] sm:$0xff]  ;;  %v826_v8 = vld [vmem:[%s2028_s27 + $0x90] sm:$0xff]  ;;  %v1255_v18 = vpack.c.bf16 %v586_v2, %v584_v0 }
 0x1e8   : > { %1244 = vmatprep.subr.bf16.mxu0 %v1243_v50  ;;  %v1269_v9 = vpack.c.bf16 %v809_v7, %v808_v6  ;;  %v827_v10 = vld [vmem:[%s2028_s27 + $0x98] sm:$0xff]  ;;  %v810_v11 = vld [vmem:[%s2028_s27 + $0x10] sm:$0xff]  ;;  %v828_v16 = vld [vmem:[%s2028_s27 + $0xa0] sm:$0xff] }
 0x1e9   : > { %v811_v12 = vld [vmem:[%s2028_s27 + $0x18] sm:$0xff]  ;;  %1268 = vmatprep.subr.bf16.mxu1 %v1267_v5  ;;  %v1271_v15 = vpack.c.bf16 %v827_v10, %v826_v8  ;;  %v829_v17 = vld [vmem:[%s2028_s27 + $0xa8] sm:$0xff]  ;;  %v583_v21 = vld [vmem:[%s2015_s24 + $0xa0] sm:$0xff] }
 0x1ea   : > { %v585_v22 = vld [vmem:[%s2015_s24 + $0xb0] sm:$0xff]  ;;  %v588_v23 = vld [vmem:[%s2015_s24 + $0xc8] sm:$0xff]  ;;  %1270 = vmatpush3.bf16.msra.mxu1 %v1269_v9  ;;  %v1273_v24 = vpack.c.bf16 %v811_v12, %v810_v11  ;;  %v590_v19 = vld [vmem:[%s2015_s24 + $0xd8] sm:$0xff]  ;;  %v1275_v25 = vpack.c.bf16 %v829_v17, %v828_v16  ;;  %v597_v12 = vlaneseq }
 0x1eb   : > { %1246 = vmatpush1.bf16.msra.mxu0 %v1245_v55  ;;  %1272 = vmatprep.subr.bf16.mxu1 %v1271_v15  ;;  %v812_v13 = vld [vmem:[%s2028_s27 + $0x20] sm:$0xff]  ;;  %v813_v26 = vld [vmem:[%s2028_s27 + $0x28] sm:$0xff]  ;;  %v1257_v29 = vpack.c.bf16 %v585_v22, %v583_v21  ;;  %v1259_v30 = vpack.c.bf16 %v590_v19, %v588_v23  ;;  %v589_v20 = vld [vmem:[%s2015_s24 + $0xd0] sm:$0xff] }
 0x1ec   : > { %1248 = vmatprep.subr.bf16.mxu0 %v1247_v56  ;;  %v587_v31 = vld [vmem:[%s2015_s24 + $0xc0] sm:$0xff]  ;;  %v1277_v32 = vpack.c.bf16 %v813_v26, %v812_v13  ;;  %v592_v27 = vld [vmem:[%s2015_s24 + $0xe8] sm:$0xff]  ;;  %v594_v33 = vld [vmem:[%s2015_s24 + $0xf8] sm:$0xff] }
 0x1ed   : > { %v1261_v34 = vpack.c.bf16 %v589_v20, %v587_v31  ;;  %v1263_v37 = vpack.c.bf16 %v594_v33, %v592_v27  ;;  %v591_v28 = vld [vmem:[%s2015_s24 + $0xe0] sm:$0xff]  ;;  %v593_v35 = vld [vmem:[%s2015_s24 + $0xf0] sm:$0xff]  ;;  %v556_v39 = vld [vmem:[#allocation2 + $0x8] sm:$0xff] }
 0x1ee   : > { %1274 = vmatpush3.bf16.msra.mxu1 %v1273_v24  ;;  %v1265_v36 = vpack.c.bf16 %v593_v35, %v591_v28  ;;  %v555_v38 = vld [vmem:[#allocation2] sm:$0xff]  ;;  %v557_v40 = vld [vmem:[#allocation2 + $0x10] sm:$0xff]  ;;  %v558_v41 = vld [vmem:[#allocation2 + $0x18] sm:$0xff] }
 0x1ef   : > { %1250 = vmatpush1.bf16.msra.mxu0 %v1249_v61  ;;  %1276 = vmatprep.subr.bf16.mxu1 %v1275_v25  ;;  %v559_v43 = vld [vmem:[#allocation2 + $0x20] sm:$0xff]  ;;  %v560_v44 = vld [vmem:[#allocation2 + $0x28] sm:$0xff]  ;;  %v561_v45 = vld [vmem:[#allocation2 + $0x30] sm:$0xff] }
 0x1f0   : > { %1252 = vmatprep.subr.bf16.mxu0 %v1251_v1  ;;  %v562_v46 = vld [vmem:[#allocation2 + $0x38] sm:$0xff]  ;;  %v830_v47 = vld [vmem:[%s2028_s27 + $0xb0] sm:$0xff]  ;;  %v832_v53 = vld [vmem:[%s2028_s27 + $0xc0] sm:$0xff] }
 0x1f1   : > { %v831_v48 = vld [vmem:[%s2028_s27 + $0xb8] sm:$0xff]  ;;  %v814_v50 = vld [vmem:[%s2028_s27 + $0x30] sm:$0xff]  ;;  %v833_v54 = vld [vmem:[%s2028_s27 + $0xc8] sm:$0xff] }
 0x1f2   : > { %1278 = vmatpush3.bf16.msra.mxu1 %v1277_v32  ;;  %v1279_v49 = vpack.c.bf16 %v831_v48, %v830_v47  ;;  %v815_v51 = vld [vmem:[%s2028_s27 + $0x38] sm:$0xff]  ;;  %v1283_v55 = vpack.c.bf16 %v833_v54, %v832_v53  ;;  %v817_v56 = vld [vmem:[%s2028_s27 + $0x48] sm:$0xff]  ;;  %v834_v58 = vld [vmem:[%s2028_s27 + $0xd0] sm:$0xff] }
 0x1f3   : > { %1254 = vmatpush1.bf16.msra.mxu0 %v1253_v14  ;;  %v1281_v52 = vpack.c.bf16 %v815_v51, %v814_v50  ;;  %v835_v59 = vld [vmem:[%s2028_s27 + $0xd8] sm:$0xff]  ;;  %v818_v61 = vld [vmem:[%s2028_s27 + $0x50] sm:$0xff]  ;;  %v836_v0 = vld [vmem:[%s2028_s27 + $0xe0] sm:$0xff]  ;;  %v598_v14 = vshrl.u32 %v597_v12, 7 }
 0x1f4   : > { %1256 = vmatprep.subr.bf16.mxu0 %v1255_v18  ;;  %1280 = vmatprep.subr.bf16.mxu1 %v1279_v49  ;;  %v1287_v60 = vpack.c.bf16 %v835_v59, %v834_v58  ;;  %v819_v62 = vld [vmem:[%s2028_s27 + $0x58] sm:$0xff]  ;;  %v837_v1 = vld [vmem:[%s2028_s27 + $0xe8] sm:$0xff]  ;;  %v820_v3 = vld [vmem:[%s2028_s27 + $0x60] sm:$0xff] }
 0x1f5   : > { %v1289_v63 = vpack.c.bf16 %v819_v62, %v818_v61  ;;  %v1291_v2 = vpack.c.bf16 %v837_v1, %v836_v0  ;;  %v821_v4 = vld [vmem:[%s2028_s27 + $0x68] sm:$0xff]  ;;  %v838_v6 = vld [vmem:[%s2028_s27 + $0xf0] sm:$0xff]  ;;  %v839_v7 = vld [vmem:[%s2028_s27 + $0xf8] sm:$0xff]  ;;  %v599_v15 = vsub.s32 0, %v598_v14  ;;  %v603_v17 = vsub.s32 1, %v598_v14 }
 0x1f6   : > { %1282 = vmatpush3.bf16.msra.mxu1 %v1281_v52  ;;  %v1293_v5 = vpack.c.bf16 %v821_v4, %v820_v3  ;;  %v1295_v8 = vpack.c.bf16 %v839_v7, %v838_v6  ;;  %v822_v9 = vld [vmem:[%s2028_s27 + $0x70] sm:$0xff]  ;;  %v823_v10 = vld [vmem:[%s2028_s27 + $0x78] sm:$0xff]  ;;  %v595_v16 = vld [vmem:[%s404_s12] sm:$0x3] }
 0x1f7   : > { %1258 = vmatpush1.bf16.msra.mxu0 %v1257_v29  ;;  %1284 = vmatprep.subr.bf16.mxu1 %v1283_v55  ;;  %v1297_v11 = vpack.c.bf16 %v823_v10, %v822_v9  ;;  %v2172_v18 = vrot.slane %v595_v16, %v599_v15  ;;  %v2174_v21 = vrot.slane %v595_v16, %v603_v17 }
 0x1f8   : > { %1260 = vmatprep.subr.bf16.mxu0 %v1259_v30 }
 0x1fb   : > { %1262 = vmatpush1.bf16.msra.mxu0 %v1261_v34 }
 0x1fc   : > { %1264 = vmatprep.subr.bf16.mxu0 %v1263_v37 }
 0x1ff   : > { %1266 = vmatpush1.bf16.msra.mxu0 %v1265_v36 }
 0x202   : > { %672 = vmatmul.mubr.f32.vlgmr.msra.gmra.mrb[0].mxu0 %v555_v38 }
 0x203   : > { %677 = vmatprep.mubr.f32.mxu0 %v1693_v42 }
 0x206   : > { %678 = vmatmul.mubr.f32.gmra.mrb[2].mxu0 %v556_v39 }
 0x207   : > { %683 = vmatprep.mubr.f32.mxu0 %v1693_v42 }
 0x20a   : > { %684 = vmatmul.mubr.f32.gmra.mrb[4].mxu0 %v557_v40 }
 0x20b   : > { %689 = vmatprep.mubr.f32.mxu0 %v1693_v42 }
 0x20e   : > { %690 = vmatmul.mubr.f32.gmra.mrb[6].mxu0 %v558_v41 }
 0x20f   : > { %695 = vmatprep.mubr.f32.mxu0 %v1693_v42 }
 0x212   : > { %696 = vmatmul.mubr.f32.gmra.mrb[8].mxu0 %v559_v43 }
 0x213   : > { %701 = vmatprep.mubr.f32.mxu0 %v1693_v42 }
 0x216   : > { %702 = vmatmul.mubr.f32.gmra.mrb[10].mxu0 %v560_v44 }
 0x217   : > { %707 = vmatprep.mubr.f32.mxu0 %v1693_v42 }
 0x21a   : > { %708 = vmatmul.mubr.f32.gmra.mrb[12].mxu0 %v561_v45 }
 0x21b   : > { %713 = vmatprep.mubr.f32.mxu0 %v1693_v42  ;;  %v816_v42 = vld [vmem:[%s2028_s27 + $0x40] sm:$0xff] }
 0x21c   : > { %v1285_v57 = vpack.c.bf16 %v817_v56, %v816_v42 }
 0x21e   : > { %714 = vmatmul.mubr.f32.gmra.mrb[14].mxu0 %v562_v46  ;;  %1286 = vmatpush3.bf16.msra.mxu1 %v1285_v57 }
 0x21f   : > { %1288 = vmatprep.subr.bf16.mxu1 %v1287_v60 }
 0x222   : > { %1290 = vmatpush3.bf16.msra.mxu1 %v1289_v63 }
 0x223   : > { %1292 = vmatprep.subr.bf16.mxu1 %v1291_v2 }
 0x226   : > { %1294 = vmatpush3.bf16.msra.mxu1 %v1293_v5 }
 0x227   : > { %1296 = vmatprep.subr.bf16.mxu1 %v1295_v8 }
 0x22a   : > { %1298 = vmatpush3.bf16.msra.mxu1 %v1297_v11 }
 0x2d5   : > { %v673_v22 = vpop.f32.mrb[0].mxu0 }
 0x2d6   : > { %v674_v23 = vadd.f32 %v673_v22, %v2172_v18  ;;  %v675_v24 = vpop.f32.mrb[1].mxu0 }
 0x2d7   : > { %v676_v19 = vadd.f32 %v675_v24, %v2174_v21 }
 0x2d8   : > { %v736_v25 = vmul.f32 0.70710677, %v674_v23  ;;  %v720_v52 = vmul.f32 0.5, %v674_v23 }
 0x2d9   : > { %v737_v13 = vmul.f32 0.70710677, %v676_v19  ;;  %v679_v26 = vpop.f32.mrb[2].mxu0  ;;  %v721_v50 = vmul.f32 0.5, %v676_v19 }
 0x2da   : > { %1435 = verf.f32 %v736_v25  ;;  %v680_v29 = vadd.f32 %v679_v26, %v2172_v18  ;;  %v681_v30 = vpop.f32.mrb[3].mxu0 }
 0x2db   : > { %1437 = verf.f32 %v737_v13  ;;  %v682_v31 = vadd.f32 %v681_v30, %v2174_v21 }
 0x2dc   : > { %v738_v20 = vmul.f32 0.70710677, %v680_v29  ;;  %v722_v1 = vmul.f32 0.5, %v680_v29 }
 0x2dd   : > { %v739_v32 = vmul.f32 0.70710677, %v682_v31  ;;  %v685_v27 = vpop.f32.mrb[4].mxu0  ;;  %v723_v61 = vmul.f32 0.5, %v682_v31 }
 0x2de   : > { %1439 = verf.f32 %v738_v20  ;;  %v686_v33 = vadd.f32 %v685_v27, %v2172_v18  ;;  %v687_v34 = vpop.f32.mrb[5].mxu0 }
 0x2df   : > { %1441 = verf.f32 %v739_v32  ;;  %v688_v37 = vadd.f32 %v687_v34, %v2174_v21 }
 0x2e0   : > { %v740_v28 = vmul.f32 0.70710677, %v686_v33  ;;  %v724_v16 = vmul.f32 0.5, %v686_v33 }
 0x2e1   : > { %v741_v35 = vmul.f32 0.70710677, %v688_v37  ;;  %v691_v36 = vpop.f32.mrb[6].mxu0  ;;  %v725_v11 = vmul.f32 0.5, %v688_v37 }
 0x2e2   : > { %1443 = verf.f32 %v740_v28  ;;  %v2183_v38 = vadd.f32 %v691_v36, %v2172_v18  ;;  %v693_v39 = vpop.f32.mrb[7].mxu0 }
 0x2e3   : > { %1445 = verf.f32 %v741_v35  ;;  %v694_v40 = vadd.f32 %v693_v39, %v2174_v21 }
 0x2e4   : > { %v1436_v41 = vpop.eup %1435  ;;  %v742_v43 = vmul.f32 0.70710677, %v2183_v38  ;;  %v726_v27 = vmul.f32 0.5, %v2183_v38 }
 0x2e5   : > { %v1438_v44 = vpop.eup %1437  ;;  %v768_v45 = vadd.f32 1.0, %v1436_v41  ;;  %v743_v46 = vmul.f32 0.70710677, %v694_v40  ;;  %v697_v47 = vpop.f32.mrb[8].mxu0  ;;  %v727_v30 = vmul.f32 0.5, %v694_v40 }
 0x2e6   : > { %1447 = verf.f32 %v742_v43  ;;  %v2188_v48 = vadd.f32 %v697_v47, %v2172_v18  ;;  %v699_v49 = vpop.f32.mrb[9].mxu0  ;;  %v769_v51 = vadd.f32 1.0, %v1438_v44 }
 0x2e7   : > { %1449 = verf.f32 %v743_v46  ;;  %v700_v53 = vadd.f32 %v699_v49, %v2174_v21  ;;  %v784_v60 = vmul.f32 %v768_v45, %v720_v52 }
 0x2e8   : > { %v1440_v54 = vpop.eup %1439  ;;  %v744_v55 = vmul.f32 0.70710677, %v2188_v48  ;;  %v785_v42 = vmul.f32 %v769_v51, %v721_v50 }
 0x2e9   : > { %v1442_v56 = vpop.eup %1441  ;;  %v770_v57 = vadd.f32 1.0, %v1440_v54  ;;  %v745_v58 = vmul.f32 0.70710677, %v700_v53  ;;  %v703_v59 = vpop.f32.mrb[10].mxu0  ;;  %v729_v40 = vmul.f32 0.5, %v700_v53 }
 0x2ea   : > { %v771_v62 = vadd.f32 1.0, %v1442_v56  ;;  %1451 = verf.f32 %v744_v55  ;;  %v2193_v63 = vadd.f32 %v703_v59, %v2172_v18  ;;  %v705_v0 = vpop.f32.mrb[11].mxu0  ;;  %904 = vmatprep.mubr.f32.mxu1 %v785_v42 }
 0x2eb   : > { %1453 = verf.f32 %v745_v58  ;;  %v706_v2 = vadd.f32 %v705_v0, %v2174_v21  ;;  %905 = vmatmul.mubr.f32.vlgmr.msra.gmra.mrb[0].mxu1 %v784_v60  ;;  %v786_v10 = vmul.f32 %v770_v57, %v722_v1 }
 0x2ec   : > { %v1444_v3 = vpop.eup %1443  ;;  %v746_v4 = vmul.f32 0.70710677, %v2193_v63  ;;  %v787_v5 = vmul.f32 %v771_v62, %v723_v61  ;;  %v730_v50 = vmul.f32 0.5, %v2193_v63 }
 0x2ed   : > { %v1446_v6 = vpop.eup %1445  ;;  %v772_v7 = vadd.f32 1.0, %v1444_v3  ;;  %v747_v8 = vmul.f32 0.70710677, %v706_v2  ;;  %v709_v9 = vpop.f32.mrb[12].mxu0  ;;  %v731_v47 = vmul.f32 0.5, %v706_v2 }
 0x2ee   : > { %v773_v12 = vadd.f32 1.0, %v1446_v6  ;;  %1455 = verf.f32 %v746_v4  ;;  %v710_v14 = vadd.f32 %v709_v9, %v2172_v18  ;;  %v711_v15 = vpop.f32.mrb[13].mxu0  ;;  %909 = vmatprep.mubr.f32.mxu1 %v787_v5  ;;  %v800_v4 = vld [vmem:[%s2030_s21] sm:$0xff]  ;;  %v801_v9 = vld [vmem:[%s2030_s21 + $0x8] sm:$0xff] }
 0x2ef   : > { %1457 = verf.f32 %v747_v8  ;;  %v712_v17 = vadd.f32 %v711_v15, %v2174_v21  ;;  %910 = vmatmul.mubr.f32.gmra.mrb[2].mxu1 %v786_v10  ;;  %v788_v29 = vmul.f32 %v772_v7, %v724_v16  ;;  %v802_v15 = vld [vmem:[%s2030_s21 + $0x10] sm:$0xff] }
 0x2f0   : > { %v1448_v22 = vpop.eup %1447  ;;  %v748_v23 = vmul.f32 0.70710677, %v710_v14  ;;  %v789_v24 = vmul.f32 %v773_v12, %v725_v11  ;;  %v732_v56 = vmul.f32 0.5, %v710_v14 }
 0x2f1   : > { %v1450_v19 = vpop.eup %1449  ;;  %v774_v25 = vadd.f32 1.0, %v1448_v22  ;;  %v749_v13 = vmul.f32 0.70710677, %v712_v17  ;;  %v715_v26 = vpop.f32.mrb[14].mxu0  ;;  %v733_v42 = vmul.f32 0.5, %v712_v17 }
 0x2f2   : > { %v775_v31 = vadd.f32 1.0, %v1450_v19  ;;  %1459 = verf.f32 %v748_v23  ;;  %v716_v20 = vadd.f32 %v715_v26, %v2172_v18  ;;  %v717_v32 = vpop.f32.mrb[15].mxu0  ;;  %914 = vmatprep.mubr.f32.mxu1 %v789_v24  ;;  %v728_v18 = vmul.f32 0.5, %v2188_v48  ;;  %v803_v24 = vld [vmem:[%s2030_s21 + $0x18] sm:$0xff] }
 0x2f3   : > { %1461 = verf.f32 %v749_v13  ;;  %v718_v33 = vadd.f32 %v717_v32, %v2174_v21  ;;  %915 = vmatmul.mubr.f32.gmra.mrb[4].mxu1 %v788_v29  ;;  %v790_v41 = vmul.f32 %v774_v25, %v726_v27  ;;  %v804_v29 = vld [vmem:[%s2030_s21 + $0x20] sm:$0xff]  ;;  %v805_v27 = vld [vmem:[%s2030_s21 + $0x28] sm:$0xff] }
 0x2f4   : > { %v1452_v34 = vpop.eup %1451  ;;  %v750_v37 = vmul.f32 0.70710677, %v716_v20  ;;  %v791_v28 = vmul.f32 %v775_v31, %v727_v30  ;;  %v734_v0 = vmul.f32 0.5, %v716_v20 }
 0x2f5   : > { %v1454_v35 = vpop.eup %1453  ;;  %v776_v36 = vadd.f32 1.0, %v1452_v34  ;;  %v751_v39 = vmul.f32 0.70710677, %v718_v33  ;;  %v735_v62 = vmul.f32 0.5, %v718_v33 }
 0x2f6   : > { %v777_v43 = vadd.f32 1.0, %v1454_v35  ;;  %1463 = verf.f32 %v750_v37  ;;  %919 = vmatprep.mubr.f32.mxu1 %v791_v28  ;;  %v806_v35 = vld [vmem:[%s2030_s21 + $0x30] sm:$0xff] }
 0x2f7   : > { %1465 = verf.f32 %v751_v39  ;;  %920 = vmatmul.mubr.f32.gmra.mrb[6].mxu1 %v790_v41  ;;  %v792_v46 = vmul.f32 %v776_v36, %v728_v18 }
 0x2f8   : > { %v1456_v38 = vpop.eup %1455  ;;  %v793_v44 = vmul.f32 %v777_v43, %v729_v40  ;;  %v807_v43 = vld [vmem:[%s2030_s21 + $0x38] sm:$0xff] }
 0x2f9   : > { %v1458_v45 = vpop.eup %1457  ;;  %v778_v21 = vadd.f32 1.0, %v1456_v38 }
 0x2fa   : > { %v779_v49 = vadd.f32 1.0, %v1458_v45  ;;  %924 = vmatprep.mubr.f32.mxu1 %v793_v44 }
 0x2fb   : > { %925 = vmatmul.mubr.f32.gmra.mrb[8].mxu1 %v792_v46  ;;  %v794_v55 = vmul.f32 %v778_v21, %v730_v50  ;;  %v1169_v21 = vld [vmem:[%s2367_s15] ss:$0 sm:$0xff] (!%p1168_p12) }
 0x2fc   : > { %v1460_v51 = vpop.eup %1459  ;;  %v795_v52 = vmul.f32 %v779_v49, %v731_v47 }
 0x2fd   : > { %v1462_v53 = vpop.eup %1461  ;;  %v780_v54 = vadd.f32 1.0, %v1460_v51 }
 0x2fe   : > { %v781_v48 = vadd.f32 1.0, %v1462_v53  ;;  %929 = vmatprep.mubr.f32.mxu1 %v795_v52 }
 0x2ff   : > { %930 = vmatmul.mubr.f32.gmra.mrb[10].mxu1 %v794_v55  ;;  %v796_v61 = vmul.f32 %v780_v54, %v732_v56 }
 0x300   : > { %v1464_v57 = vpop.eup %1463  ;;  %v797_v58 = vmul.f32 %v781_v48, %v733_v42 }
 0x301   : > { %v1466_v59 = vpop.eup %1465  ;;  %v782_v60 = vadd.f32 1.0, %v1464_v57 }
 0x302   : > { %v783_v63 = vadd.f32 1.0, %v1466_v59  ;;  %934 = vmatprep.mubr.f32.mxu1 %v797_v58 }
 0x303   : > { %935 = vmatmul.mubr.f32.gmra.mrb[12].mxu1 %v796_v61  ;;  %v798_v2 = vmul.f32 %v782_v60, %v734_v0 }
 0x304   : > { %v799_v1 = vmul.f32 %v783_v63, %v735_v62 }
 0x306   : > { %939 = vmatprep.mubr.f32.mxu1 %v799_v1 }
 0x307   : > { %940 = vmatmul.mubr.f32.gmra.mrb[14].mxu1 %v798_v2 }
 0x3be   : > { %v1211_v3 = vpop.f32.mrb[0].mxu1 }
 0x3bf   : > { %v1212_v5 = vpop.f32.mrb[1].mxu1 }
 0x3c0   : > { %v1213_v6 = vadd.f32 %v1212_v5, %v1211_v3 }
 0x3c2   : > { %v945_v7 = vadd.f32 %v1213_v6, %v800_v4  ;;  %v1214_v8 = vpop.f32.mrb[2].mxu1 }
 0x3c3   : > { %v1215_v10 = vpop.f32.mrb[3].mxu1 }
 0x3c4   : > { %953 = vst [vmem:[%s2030_s21] sm:$0xff] %v945_v7  ;;  %v1216_v11 = vadd.f32 %v1215_v10, %v1214_v8 }
 0x3c6   : > { %v946_v12 = vadd.f32 %v1216_v11, %v801_v9  ;;  %v1217_v14 = vpop.f32.mrb[4].mxu1 }
 0x3c7   : > { %v1218_v16 = vpop.f32.mrb[5].mxu1 }
 0x3c8   : > { %954 = vst [vmem:[%s2030_s21 + $0x8] sm:$0xff] %v946_v12  ;;  %v1219_v17 = vadd.f32 %v1218_v16, %v1217_v14 }
 0x3ca   : > { %v947_v22 = vadd.f32 %v1219_v17, %v802_v15  ;;  %v1220_v23 = vpop.f32.mrb[6].mxu1 }
 0x3cb   : > { %v1221_v19 = vpop.f32.mrb[7].mxu1  ;;  %v965_v45 = vld [vmem:[%s2030_s21] sm:$0xff] (!%p1168_p12) }
 0x3cc   : > { %955 = vst [vmem:[%s2030_s21 + $0x10] sm:$0xff] %v947_v22  ;;  %v1222_v25 = vadd.f32 %v1221_v19, %v1220_v23  ;;  %v980_v47 = vadd.f32 (!%p1168_p12), %v1169_v21, %v965_v45 }
 0x3ce   : > { %v948_v13 = vadd.f32 %v1222_v25, %v803_v24  ;;  %v1223_v26 = vpop.f32.mrb[8].mxu1  ;;  %988 = vst [vmem:[%s2030_s21] sm:$0xff] (!%p1168_p12), %v980_v47 }
 0x3cf   : > { %v1224_v30 = vpop.f32.mrb[9].mxu1  ;;  %v966_v46 = vld [vmem:[%s2030_s21 + $0x8] sm:$0xff] (!%p1168_p12) }
 0x3d0   : > { %956 = vst [vmem:[%s2030_s21 + $0x18] sm:$0xff] %v948_v13  ;;  %v1225_v31 = vadd.f32 %v1224_v30, %v1223_v26  ;;  %v981_v49 = vadd.f32 (!%p1168_p12), %v1169_v21, %v966_v46 }
 0x3d2   : > { %v949_v20 = vadd.f32 %v1225_v31, %v804_v29  ;;  %v1226_v32 = vpop.f32.mrb[10].mxu1  ;;  %989 = vst [vmem:[%s2030_s21 + $0x8] sm:$0xff] (!%p1168_p12), %v981_v49 }
 0x3d3   : > { %v1227_v33 = vpop.f32.mrb[11].mxu1  ;;  %v967_v50 = vld [vmem:[%s2030_s21 + $0x10] sm:$0xff] (!%p1168_p12) }
 0x3d4   : > { %957 = vst [vmem:[%s2030_s21 + $0x20] sm:$0xff] %v949_v20  ;;  %v1228_v34 = vadd.f32 %v1227_v33, %v1226_v32  ;;  %v982_v53 = vadd.f32 (!%p1168_p12), %v1169_v21, %v967_v50 }
 0x3d6   : > { %v950_v37 = vadd.f32 %v1228_v34, %v805_v27  ;;  %v1229_v28 = vpop.f32.mrb[12].mxu1  ;;  %990 = vst [vmem:[%s2030_s21 + $0x10] sm:$0xff] (!%p1168_p12), %v982_v53 }
 0x3d7   : > { %v1230_v36 = vpop.f32.mrb[13].mxu1  ;;  %v968_v51 = vld [vmem:[%s2030_s21 + $0x18] sm:$0xff] (!%p1168_p12) }
 0x3d8   : > { %958 = vst [vmem:[%s2030_s21 + $0x28] sm:$0xff] %v950_v37  ;;  %v1231_v39 = vadd.f32 %v1230_v36, %v1229_v28  ;;  %v983_v54 = vadd.f32 (!%p1168_p12), %v1169_v21, %v968_v51 }
 0x3da   : > { %v951_v41 = vadd.f32 %v1231_v39, %v806_v35  ;;  %v1232_v40 = vpop.f32.mrb[14].mxu1  ;;  %964 = sbr.rel (%p1168_p12) target bundleno = 1003 (0x3eb), region = 68  ;;  %991 = vst [vmem:[%s2030_s21 + $0x18] sm:$0xff] (!%p1168_p12), %v983_v54 }
 0x3db   : > { %v1233_v18 = vpop.f32.mrb[15].mxu1  ;;  %v969_v52 = vld [vmem:[%s2030_s21 + $0x20] sm:$0xff] (!%p1168_p12) }
 0x3dc   : > { %959 = vst [vmem:[%s2030_s21 + $0x30] sm:$0xff] %v951_v41  ;;  %v1234_v38 = vadd.f32 %v1233_v18, %v1232_v40  ;;  %v984_v55 = vadd.f32 (!%p1168_p12), %v1169_v21, %v969_v52 }
 0x3de   : > { %v952_v44 = vadd.f32 %v1234_v38, %v807_v43  ;;  %992 = vst [vmem:[%s2030_s21 + $0x20] sm:$0xff] (!%p1168_p12), %v984_v55 }
 0x3df   : > { %v970_v42 = vld [vmem:[%s2030_s21 + $0x28] sm:$0xff] (!%p1168_p12) }
 0x3e0   : > { %960 = vst [vmem:[%s2030_s21 + $0x38] sm:$0xff] %v952_v44  ;;  %v985_v57 = vadd.f32 (!%p1168_p12), %v1169_v21, %v970_v42 }
 0x3e2   : > { %993 = vst [vmem:[%s2030_s21 + $0x28] sm:$0xff] %v985_v57 }
 0x3e3   : > { %v971_v48 = vld [vmem:[%s2030_s21 + $0x30] sm:$0xff] }
 0x3e4   : > { %v986_v58 = vadd.f32 %v1169_v21, %v971_v48 }
 0x3e6   : > { %994 = vst [vmem:[%s2030_s21 + $0x30] sm:$0xff] %v986_v58 }
 0x3e7   : > { %v972_v56 = vld [vmem:[%s2030_s21 + $0x38] sm:$0xff] }
 0x3e8   : > { %v987_v59 = vadd.f32 %v1169_v21, %v972_v56 }
 0x3ea   : > { %995 = vst [vmem:[%s2030_s21 + $0x38] sm:$0xff] %v987_v59 }
 0x3eb PF: > { %s2368_s30 = sld [smem:[#allocation15_spill]]  ;;  %s2369_s14 = sld [smem:[#allocation25_spill]] }
 0x3ec   : > { %s1010_s12 = sshll.u32 %s2030_s21, 4  ;;  %s997_s27 = scalar_lea.sflag [#allocation5], %s2003_s18  ;;  %s2247_s12 = int_to_ptr.vmem [resolvable:$true] %s1010_s12 }
 0x3ed   : > { %s1557_s17 = scalar_lea.vmem %s2247_s12, 1024  ;;  %p2370_p2 = scmp.ne.s32.totalorder %s2355_s22, 0 }
 0x3ee   : > { %p1558_p13 = scmp.ne.s32.totalorder %s2247_s12, %s1557_s17  ;;  %s1694_s1 = smov [#allocation9]  }
 0x3ef   : > { %s1561_s16 = sshll.u32 %s1694_s1, 4  ;;  %s1562_s16 = int_to_ptr.vmem [resolvable:$false] %s1561_s16 }
 0x3f0   : > { %p1559_p11 = pnand %p1558_p13, %p2370_p2  ;;  %s1563_s23 = scalar_lea.vmem %s1562_s16, 2048 }
 0x3f1   : > { %s1178_s20 = sshll.u32 %s2368_s30, 10  ;;  %p1564_p5 = scmp.lt.s32.totalorder %s2247_s12, %s1562_s16 }
 0x3f2   : > { %s2244_s9 = scalar_lea.hbm %s2369_s14, %s1178_s20  ;;  %p1560_p7 = pneg %p1559_p11 }
 0x3f3   : > { %p1565_p0 = scmp.lt.s32.totalorder %s1563_s23, %s1557_s17 }
 0x3f5   : > { %p1566_p3 = por %p1565_p0, %p1564_p5 }
 0x3f7   : > { %p1567_p1 = pnand %p1566_p3, %p1560_p7 }
 0x3f9   : > { %1570 = shalt.err (!%p1567_p1)
}
 0x3fa   : > { %s1571_s21 = scalar_lea.hbm %s2244_s9, 1024  ;;  %s1575_s19 = scalar_lea.hbm %s2369_s14, 2048 }
 0x3fb   : > { %p1572_p10 = scmp.ne.s32.totalorder %s2244_s9, %s1571_s21  ;;  %p1576_p6 = scmp.lt.u32.totalorder %s2244_s9, %s2369_s14 }
 0x3fc   : > { %p1577_p4 = scmp.lt.u32.totalorder %s1575_s19, %s1571_s21  ;;  %p1579_p13 = scmp.lt.u32.totalorder %s1571_s21, %s2244_s9 }
 0x3fd   : > { %p1573_p8 = pnand %p1572_p10, %p2370_p2 }
 0x3fe   : > { %p1578_p12 = por %p1577_p4, %p1576_p6 }
 0x3ff   : > { %p1574_p9 = pneg %p1573_p8 }
 0x400   : > { %p1580_p11 = por %p1579_p13, %p1578_p12 }
 0x402   : > { %p1581_p7 = pnand %p1580_p11, %p1574_p9 }
 0x404   : > { %1584 = shalt.err (!%p1581_p7)
}
 0x405   : > { %s1695_s8 = smov 128   ;;  %s1696_s15 = smov 8  }
 0x406   : > { %1305 = dma.vmem_to_hbm [thread:$0]  (%p2370_p2), %s2247_s12, 1024, %s2244_s9, %s997_s27, %s1695_s8, %s1695_s8, %s1696_s15  }
 0x407 PF: > { %s2371_s30 = sld [smem:[#allocation14_spill]]  ;;  %p1322_p5 = scmp.ge.s32.totalorder %s1683_s11, 2 }
 0x408   : > { %p2372_p0 = scmp.ne.s32.totalorder %s2356_s13, 0 }
 0x40a   : > { %p1318_p3 = pnand %p1322_p5, %p2372_p0 }
 0x40d   : > { %s1025_s20 = sand.u32 1, %s2371_s30  }
 0x40e   : > { %s1026_s24 = scalar_lea.sflag [#allocation5], %s1025_s20 }
 0x40f   : > { %1638 = dma.done.wait (!%p1318_p3), %s1026_s24, 1024  }
 0x410   : > { %1640 = vsyncadd (!%p1318_p3), %s1026_s24, 4294966272  ;;  %s26_s11 = sadd.s32 1, %s1683_s11   ;;  %s2373_s2 = sld [smem:[#allocation13_spill]] }
 0x411   : > { %p23_p1 = scmp.ge.s32.totalorder %s26_s11, 6   ;;  %s2374_s17 = sld [smem:[#allocation18_spill]] }
 0x412   : > { %s2375_s22 = smov %s1924_s26  ;;  %s2376_s30 = sld [smem:[#allocation16_spill]] }
 0x413   : > { %s2377_s9 = sld [smem:[#allocation17_spill]]  ;;  %s2378_s18 = sld [smem:[#allocation19_spill]] }
 0x414   : > { %s2379_s24 = smov %s1647_s25  ;;  %s2382_s27 = smov %s1659_s28 }
 0x415   : > { %s2383_s28 = smov %s1663_s29  ;;  %s2384_s29 = smov %s2375_s22 }
 0x416   : > { %s2380_s25 = smov %s2373_s2  ;;  %s2385_s8 = smov %s1679_s10 }
 0x417   : > { %s2381_s26 = smov %s2374_s17  ;;  %25 = sbr.rel (!%p23_p1) target bundleno = 18 (0x12), region = 128 }
 0x419   : > { %s2386_s10 = smov %s2378_s18 }
 0x41e   :  { %1031 = vsyncpa [#allocation4], 1 }
 0x41f   :  { %1033 = vsyncpa [#allocation4 + $0x1], 1 }
 0x420   :  { %1034 = vsyncpa [#allocation7], 1 }
 0x421   :  { %1036 = vsyncpa [#allocation7 + $0x1], 1 }
 0x422   :  { %1037 = vsyncpa [#allocation5], 1 }
 0x423   :  { %1039 = vsyncpa [#allocation5 + $0x1], 1 }

</bundles_post_ra>
